<compile_context>
chip_gen: v7x
topology: tpu7x:2x2x1
jax: 0.10.0
libtpu: 0.0.40
codegen_flags: <defaults>
</compile_context>

<pallas_src>
import math
import functools

import jax
import jax.numpy as jnp
from jax.experimental import pallas as pl
from jax.experimental.pallas import tpu as pltpu

BN_EPS = 1e-5
NORM_EPS = 1e-12
LANE = 128
MXU_DTYPE = jnp.bfloat16          # MXU operand dtype (accumulate in f32)


def _round_up(n, m):
    return ((n + m - 1) // m) * m


# ----------------------------------------------------------------------------
# Kernels
# ----------------------------------------------------------------------------
def _fold_features(x_ref, t1_ref, t2_ref,
                   cnn_scale_ref, cnn_shift_ref, bert_scale_ref, bert_shift_ref,
                   w_img_ref, w_t1_ref, w_t2_ref, b_ref):
    """cnn_bn / bert_bn (folded) -> (Dropout->Linear->fc_bn folded)."""
    # eval-mode BatchNorm1d folded to 1 mul + 1 add per element (f32 VPU math)
    x = x_ref[...] * cnn_scale_ref[...] + cnn_shift_ref[...]
    t1 = t1_ref[...] * bert_scale_ref[...] + bert_shift_ref[...]
    t2 = t2_ref[...] * bert_scale_ref[...] + bert_shift_ref[...]
    wd = w_img_ref.dtype
    # concat([x, t1, t2]) @ fc_w  ==  three row-block matmuls (no concat in HBM);
    # fc_bn is already folded into w_* / b; bf16 MXU operands, f32 accumulate.
    y = jnp.dot(x.astype(wd), w_img_ref[...], preferred_element_type=jnp.float32)
    y = y + jnp.dot(t1.astype(wd), w_t1_ref[...], preferred_element_type=jnp.float32)
    y = y + jnp.dot(t2.astype(wd), w_t2_ref[...], preferred_element_type=jnp.float32)
    return y + b_ref[...]


def fused_head_kernel(label_ref, x_ref, t1_ref, t2_ref,
                      cnn_scale_ref, cnn_shift_ref, bert_scale_ref, bert_shift_ref,
                      w_img_ref, w_t1_ref, w_t2_ref, b_ref, wnt_ref,
                      logits_ref, ret_ref, fn_ref,
                      *, s, cos_m, sin_m, th, mm, tn):
    ci = pl.program_id(1)

    # Embedding + L2 normalization computed once per batch tile, reused by
    # every class tile via the persistent bf16 VMEM scratch fn_ref.
    @pl.when(ci == 0)
    def _():
        ret = _fold_features(x_ref, t1_ref, t2_ref,
                             cnn_scale_ref, cnn_shift_ref,
                             bert_scale_ref, bert_shift_ref,
                             w_img_ref, w_t1_ref, w_t2_ref, b_ref)
        ret_ref[...] = ret
        fn = ret * jax.lax.rsqrt(jnp.sum(ret * ret, axis=1, keepdims=True) + NORM_EPS)
        fn_ref[...] = fn.astype(fn_ref.dtype)

    # ArcMarginProduct (easy_margin=False) on one lane-dense class tile.
    cosine = jnp.dot(fn_ref[...], wnt_ref[...], preferred_element_type=jnp.float32)
    sine = jnp.sqrt(jnp.clip(1.0 - cosine * cosine, 0.0, 1.0))
    phi = cosine * cos_m - sine * sin_m
    phi = jnp.where(cosine > th, phi, cosine - mm)
    # scatter_(label) -> iota compare, offset by this tile's class base.
    classes = ci * tn + jax.lax.broadcasted_iota(jnp.int32, cosine.shape, 1)
    logits_ref[...] = jnp.where(classes == label_ref[...], phi, cosine) * s


def embed_only_kernel(x_ref, t1_ref, t2_ref,
                      cnn_scale_ref, cnn_shift_ref, bert_scale_ref, bert_shift_ref,
                      w_img_ref, w_t1_ref, w_t2_ref, b_ref, ret_ref):
    ret_ref[...] = _fold_features(x_ref, t1_ref, t2_ref,
                                  cnn_scale_ref, cnn_shift_ref,
                                  bert_scale_ref, bert_shift_ref,
                                  w_img_ref, w_t1_ref, w_t2_ref, b_ref)


# ----------------------------------------------------------------------------
# ShopeeNet (Pallas) — parameters + forward
# ----------------------------------------------------------------------------
class ShopeeNetPallas:
    def __init__(self, key, *, img_channels=4, cnn_features=32, hidden_size=32,
                 vocab_size=50, linear_out=32, num_classes=64, s=32.0, m=0.5,
                 class_tile=1024, vmem_limit_bytes=48 * 1024 * 1024):
        self.s, self.m = float(s), float(m)
        self.cnn_features = cnn_features
        self.hidden_size = hidden_size
        self.linear_out = linear_out
        self.num_classes = num_classes
        self.vmem_limit_bytes = int(vmem_limit_bytes)

        # lane-dense padding for the embedding and class dims
        self.linear_out_pad = _round_up(linear_out, LANE)
        ct = _round_up(int(class_tile), LANE)
        self.class_tile = min(ct, _round_up(num_classes, LANE))
        self.num_classes_pad = _round_up(num_classes, self.class_tile)

        ks = jax.random.split(key, 16)

        # TODO(synk): EfficientNet-b3 backbone not translated; stand-in = GAP + linear.
        self.cnn_w = jax.random.normal(ks[0], (img_channels, cnn_features), jnp.float32) * 0.1
        # TODO(synk): BERT backbone not translated; stand-in = deterministic embedding lookup.
        self.bert_emb = jax.random.normal(ks[1], (vocab_size, hidden_size), jnp.float32) * 0.1

        def bn_params(k, c):
            k1, k2, k3, k4 = jax.random.split(k, 4)
            return (jax.random.uniform(k1, (c,), jnp.float32, 0.5, 1.5),   # gamma
                    jax.random.normal(k2, (c,), jnp.float32) * 0.1,        # beta
                    jax.random.normal(k3, (c,), jnp.float32) * 0.1,        # running_mean
                    jax.random.uniform(k4, (c,), jnp.float32, 0.5, 1.5))   # running_var

        # raw (PyTorch-style) parameters — kept for the pure-JAX reference
        self.cnn_bn = bn_params(ks[2], cnn_features)
        self.bert_bn = bn_params(ks[3], hidden_size)

        n_feat_concat = cnn_features + 2 * hidden_size
        lim = math.sqrt(6.0 / (n_feat_concat + linear_out))
        self.fc_w = jax.random.uniform(ks[4], (n_feat_concat, linear_out), jnp.float32, -lim, lim)
        self.fc_b = jax.random.normal(ks[5], (linear_out,), jnp.float32) * 0.01
        self.fc_bn = bn_params(ks[6], linear_out)

        lim2 = math.sqrt(6.0 / (linear_out + num_classes))
        self.arc_w = jax.random.uniform(ks[7], (num_classes, linear_out), jnp.float32, -lim2, lim2)

        # ---- one-time folding of all static, eval-mode transforms ----------
        def fold_bn(p):
            g, b, mu, var = p
            scale = g * jax.lax.rsqrt(var + BN_EPS)
            shift = b - mu * scale
            return scale.reshape(1, -1), shift.reshape(1, -1)

        self.cnn_scale, self.cnn_shift = fold_bn(self.cnn_bn)
        self.bert_scale, self.bert_shift = fold_bn(self.bert_bn)

        # fc_bn folded into the linear weight/bias; columns zero-padded to O_pad
        fg, fb, fmu, fvar = self.fc_bn
        fc_scale = fg * jax.lax.rsqrt(fvar + BN_EPS)                         # (O,)
        fc_w_fold = self.fc_w * fc_scale[None, :]                            # [F_concat, O]
        b_fold = (self.fc_b - fmu) * fc_scale + fb                           # (O,)
        o_extra = self.linear_out_pad - linear_out
        fc_w_fold = jnp.pad(fc_w_fold, ((0, 0), (0, o_extra)))
        self.b_fold = jnp.pad(b_fold, (0, o_extra)).reshape(1, self.linear_out_pad)
        self.w_img = fc_w_fold[:cnn_features].astype(MXU_DTYPE)
        self.w_t1 = fc_w_fold[cnn_features:cnn_features + hidden_size].astype(MXU_DTYPE)
        self.w_t2 = fc_w_fold[cnn_features + hidden_size:].astype(MXU_DTYPE)

        # ArcFace weight: L2-normalize rows, transpose, zero-pad to (O_pad, C_pad), bf16.
        # TODO(synk): F.normalize uses x / max(||x||, eps); rsqrt(sum+eps) differs
        # only for near-zero rows.
        wn = self.arc_w * jax.lax.rsqrt(
            jnp.sum(self.arc_w * self.arc_w, axis=1, keepdims=True) + NORM_EPS)
        self.arc_wnt_pad = jnp.pad(
            wn.T, ((0, o_extra), (0, self.num_classes_pad - num_classes))
        ).astype(MXU_DTYPE)

    # ----- backbone stand-ins (plain JAX glue) -----
    def _cnn(self, x_image):                      # NCHW -> [B, cnn_features]
        gap = jnp.mean(x_image, axis=(2, 3))      # [B, C_img]
        return gap @ self.cnn_w

    def _bert(self, input_ids, attention_mask):   # -> [B, S, hidden]
        # TODO(synk): attention_mask unused in pooling — matches the PyTorch module,
        # which mean-pools last_hidden_state over all S positions.
        del attention_mask
        return jnp.take(self.bert_emb, input_ids, axis=0)

    def _cost(self, b_pad, with_arcface):
        o = self.linear_out_pad
        f_in = self.cnn_features + 2 * self.hidden_size
        flops = 2 * b_pad * f_in * o
        bytes_acc = 4 * b_pad * (f_in + o) + 2 * f_in * o + 4 * o
        trans = b_pad
        if with_arcface:
            c = self.num_classes_pad
            flops += 2 * b_pad * o * c
            bytes_acc += 2 * o * c + 4 * b_pad * c       # class weight dominates
            trans += b_pad * c
        return pl.CostEstimate(flops=int(flops), transcendentals=int(trans),
                               bytes_accessed=int(bytes_acc))

    # ----- forward -----
    def forward(self, X_image, input_ids, attention_mask, input_ids2, attention_mask2,
                label=None):
        x = self._cnn(X_image)
        # Mean-pool OUTSIDE the kernel: one XLA reduce each, kernel only sees [B, H].
        t1 = jnp.mean(self._bert(input_ids, attention_mask), axis=1)
        t2 = jnp.mean(self._bert(input_ids2, attention_mask2), axis=1)

        B = x.shape[0]
        cf, hs, o_pad = self.cnn_features, self.hidden_size, self.linear_out_pad

        # Batch tiling: pad to a sublane multiple; production batches get a real
        # "parallel" batch grid (and fill the MXU M dimension).
        tm = min(128, _round_up(B, 8))
        b_pad = _round_up(B, tm)
        nb = b_pad // tm

        def pad_rows(a):
            return jnp.pad(a, ((0, b_pad - B), (0, 0)))

        common = (pad_rows(x), pad_rows(t1), pad_rows(t2),
                  self.cnn_scale, self.cnn_shift, self.bert_scale, self.bert_shift,
                  self.w_img, self.w_t1, self.w_t2, self.b_fold)

        if label is None:
            blk_b = lambda bi: (bi, 0)
            blk_0 = lambda bi: (0, 0)
            in_specs = [
                pl.BlockSpec((tm, cf), blk_b),
                pl.BlockSpec((tm, hs), blk_b),
                pl.BlockSpec((tm, hs), blk_b),
                pl.BlockSpec((1, cf), blk_0),
                pl.BlockSpec((1, cf), blk_0),
                pl.BlockSpec((1, hs), blk_0),
                pl.BlockSpec((1, hs), blk_0),
                pl.BlockSpec((cf, o_pad), blk_0),
                pl.BlockSpec((hs, o_pad), blk_0),
                pl.BlockSpec((hs, o_pad), blk_0),
                pl.BlockSpec((1, o_pad), blk_0),
            ]
            ret_pad = pl.pallas_call(
                embed_only_kernel,
                grid=(nb,),
                out_shape=jax.ShapeDtypeStruct((b_pad, o_pad), jnp.float32),
                in_specs=in_specs,
                out_specs=pl.BlockSpec((tm, o_pad), blk_b),
                compiler_params=pltpu.CompilerParams(
                    dimension_semantics=("parallel",),
                    vmem_limit_bytes=self.vmem_limit_bytes),
                cost_estimate=self._cost(b_pad, with_arcface=False),
            )(*common)
            return ret_pad[:B, :self.linear_out]

        tn = self.class_tile
        nc = self.num_classes_pad // tn
        label_col = jnp.pad(label.astype(jnp.int32), (0, b_pad - B)).reshape(b_pad, 1)

        blk_b = lambda bi, ci: (bi, 0)
        blk_0 = lambda bi, ci: (0, 0)
        blk_c = lambda bi, ci: (0, ci)
        blk_bc = lambda bi, ci: (bi, ci)

        kernel = functools.partial(
            fused_head_kernel,
            s=self.s,
            cos_m=math.cos(self.m),
            sin_m=math.sin(self.m),
            th=math.cos(math.pi - self.m),
            mm=math.sin(math.pi - self.m) * self.m,
            tn=tn,
        )
        in_specs = [
            pl.BlockSpec((tm, 1), blk_b),                 # label (tiny; see TODO above)
            pl.BlockSpec((tm, cf), blk_b),
            pl.BlockSpec((tm, hs), blk_b),
            pl.BlockSpec((tm, hs), blk_b),
            pl.BlockSpec((1, cf), blk_0),
            pl.BlockSpec((1, cf), blk_0),
            pl.BlockSpec((1, hs), blk_0),
            pl.BlockSpec((1, hs), blk_0),
            pl.BlockSpec((cf, o_pad), blk_0),
            pl.BlockSpec((hs, o_pad), blk_0),
            pl.BlockSpec((hs, o_pad), blk_0),
            pl.BlockSpec((1, o_pad), blk_0),
            pl.BlockSpec((o_pad, tn), blk_c),             # double-buffered class-weight tile
        ]
        out_specs = (
            pl.BlockSpec((tm, tn), blk_bc),               # logits: lane-dense tile
            pl.BlockSpec((tm, o_pad), blk_b),             # ret: resident across class axis
        )
        logits_pad, ret_pad = pl.pallas_call(
            kernel,
            grid=(nb, nc),
            out_shape=(jax.ShapeDtypeStruct((b_pad, self.num_classes_pad), jnp.float32),
                       jax.ShapeDtypeStruct((b_pad, o_pad), jnp.float32)),
            in_specs=in_specs,
            out_specs=out_specs,
            scratch_shapes=[pltpu.VMEM((tm, o_pad), MXU_DTYPE)],   # normalized features
            compiler_params=pltpu.CompilerParams(
                dimension_semantics=("parallel", "arbitrary"),
                vmem_limit_bytes=self.vmem_limit_bytes),
            cost_estimate=self._cost(b_pad, with_arcface=True),
        )(label_col, *common, self.arc_wnt_pad)
        return logits_pad[:B, :self.num_classes], ret_pad[:B, :self.linear_out]


# ----------------------------------------------------------------------------
# pure-JAX reference (sanity check only; uses the raw, un-folded f32 parameters)
# ----------------------------------------------------------------------------
def _ref_forward(model, X_image, ids1, am1, ids2, am2, label):
    def bn(v, p):
        g, b, mu, var = p
        return (v - mu) / jnp.sqrt(var + BN_EPS) * g + b

    x = bn(model._cnn(X_image), model.cnn_bn)
    t1 = bn(jnp.mean(model._bert(ids1, am1), axis=1), model.bert_bn)
    t2 = bn(jnp.mean(model._bert(ids2, am2), axis=1), model.bert_bn)
    feat = jnp.concatenate([x, t1, t2], axis=1)
    ret = bn(feat @ model.fc_w + model.fc_b, model.fc_bn)

    fn = ret / jnp.sqrt(jnp.sum(ret * ret, axis=1, keepdims=True) + NORM_EPS)
    wn = model.arc_w / jnp.sqrt(jnp.sum(model.arc_w ** 2, axis=1, keepdims=True) + NORM_EPS)
    cosine = fn @ wn.T
    sine = jnp.sqrt(jnp.clip(1.0 - cosine ** 2, 0.0, 1.0))
    phi = cosine * math.cos(model.m) - sine * math.sin(model.m)
    phi = jnp.where(cosine > math.cos(math.pi - model.m), phi,
                    cosine - math.sin(math.pi - model.m) * model.m)
    one_hot = jax.nn.one_hot(label, model.num_classes, dtype=cosine.dtype)
    logits = (one_hot * phi + (1.0 - one_hot) * cosine) * model.s
    return logits, ret


if __name__ == "__main__":
    B, C_IMG, HW, SEQ = 8, 4, 16, 8
    HIDDEN, CNN_FEAT, LINEAR_OUT, NUM_CLASSES, VOCAB = 32, 32, 32, 64, 50

    key = jax.random.PRNGKey(0)
    k_model, k_img, k_ids1, k_ids2, k_lbl = jax.random.split(key, 5)

    model = ShopeeNetPallas(k_model, img_channels=C_IMG, cnn_features=CNN_FEAT,
                            hidden_size=HIDDEN, vocab_size=VOCAB,
                            linear_out=LINEAR_OUT, num_classes=NUM_CLASSES)

    X_image = jax.random.normal(k_img, (B, C_IMG, HW, HW), jnp.float32)
    input_ids = jax.random.randint(k_ids1, (B, SEQ), 0, VOCAB)
    attention_mask = jnp.ones((B, SEQ), jnp.int32)
    input_ids2 = jax.random.randint(k_ids2, (B, SEQ), 0, VOCAB)
    attention_mask2 = jnp.ones((B, SEQ), jnp.int32)
    label = jax.random.randint(k_lbl, (B,), 0, NUM_CLASSES)

    logits, emb = model.forward(X_image, input_ids, attention_mask,
                                input_ids2, attention_mask2, label)
    emb_only = model.forward(X_image, input_ids, attention_mask,
                             input_ids2, attention_mask2, None)
    jax.block_until_ready((logits, emb, emb_only))

    ref_logits, ref_emb = _ref_forward(model, X_image, input_ids, attention_mask,
                                       input_ids2, attention_mask2, label)
    assert logits.shape == (B, NUM_CLASSES) and emb.shape == (B, LINEAR_OUT)
    # tolerances account for bf16 MXU operands vs the all-f32 reference
    # (logits are additionally scaled by s=32).
    assert jnp.allclose(emb, ref_emb, atol=5e-2, rtol=5e-2)
    assert jnp.allclose(emb_only, ref_emb, atol=5e-2, rtol=5e-2)
    assert jnp.allclose(logits, ref_logits, atol=2e-1, rtol=5e-2)

    print("KERNEL_OK")
</pallas_src>

<mosaic_0001>
module attributes {stable_mosaic.version = 11 : i64} {
  func.func @fused_head_kernel(%arg0: i32, %arg1: i32, %arg2: memref<8x1xi32, #tpu.memory_space<vmem>>, %arg3: memref<8x32xf32, #tpu.memory_space<vmem>>, %arg4: memref<8x32xf32, #tpu.memory_space<vmem>>, %arg5: memref<8x32xf32, #tpu.memory_space<vmem>>, %arg6: memref<1x32xf32, #tpu.memory_space<vmem>>, %arg7: memref<1x32xf32, #tpu.memory_space<vmem>>, %arg8: memref<1x32xf32, #tpu.memory_space<vmem>>, %arg9: memref<1x32xf32, #tpu.memory_space<vmem>>, %arg10: memref<32x128xbf16, #tpu.memory_space<vmem>>, %arg11: memref<32x128xbf16, #tpu.memory_space<vmem>>, %arg12: memref<32x128xbf16, #tpu.memory_space<vmem>>, %arg13: memref<1x128xf32, #tpu.memory_space<vmem>>, %arg14: memref<128x128xbf16, #tpu.memory_space<vmem>>, %arg15: memref<8x128xf32, #tpu.memory_space<vmem>>, %arg16: memref<8x128xf32, #tpu.memory_space<vmem>>, %arg17: memref<8x128xbf16, #tpu.memory_space<vmem>>) attributes {dimension_semantics = [#tpu.dimension_semantics<parallel>, #tpu.dimension_semantics<arbitrary>], iteration_bounds = array<i64: 1, 1>, scalar_prefetch = 0 : i64, scratch_operands = 1 : i64, tpu.core_type = #tpu.core_type<tc>, window_params = [{transform_indices = @transform_0, window_bounds = array<i64: 8, 1>}, {transform_indices = @transform_1, window_bounds = array<i64: 8, 32>}, {transform_indices = @transform_2, window_bounds = array<i64: 8, 32>}, {transform_indices = @transform_3, window_bounds = array<i64: 8, 32>}, {pipeline_mode = #tpu.pipeline_mode<synchronous>, transform_indices = @transform_4, window_bounds = array<i64: 1, 32>}, {pipeline_mode = #tpu.pipeline_mode<synchronous>, transform_indices = @transform_5, window_bounds = array<i64: 1, 32>}, {pipeline_mode = #tpu.pipeline_mode<synchronous>, transform_indices = @transform_6, window_bounds = array<i64: 1, 32>}, {pipeline_mode = #tpu.pipeline_mode<synchronous>, transform_indices = @transform_7, window_bounds = array<i64: 1, 32>}, {pipeline_mode = #tpu.pipeline_mode<synchronous>, transform_indices = @transform_8, window_bounds = array<i64: 32, 128>}, {pipeline_mode = #tpu.pipeline_mode<synchronous>, transform_indices = @transform_9, window_bounds = array<i64: 32, 128>}, {pipeline_mode = #tpu.pipeline_mode<synchronous>, transform_indices = @transform_10, window_bounds = array<i64: 32, 128>}, {pipeline_mode = #tpu.pipeline_mode<synchronous>, transform_indices = @transform_11, window_bounds = array<i64: 1, 128>}, {transform_indices = @transform_12, window_bounds = array<i64: 128, 128>}, {transform_indices = @transform_13, window_bounds = array<i64: 8, 128>}, {transform_indices = @transform_14, window_bounds = array<i64: 8, 128>}]} {
    %c0_i32 = arith.constant 0 : i32
    %0 = arith.cmpi eq, %arg1, %c0_i32 : i32
    %1 = arith.extui %0 : i1 to i32
    %c0_i32_0 = arith.constant 0 : i32
    %2 = arith.cmpi ne, %1, %c0_i32_0 : i32
    scf.if %2 {
      %c0_16 = arith.constant 0 : index
      %c0_17 = arith.constant 0 : index
      %35 = vector.load %arg3[%c0_16, %c0_17] : memref<8x32xf32, #tpu.memory_space<vmem>>, vector<8x32xf32>
      %c0_18 = arith.constant 0 : index
      %c0_19 = arith.constant 0 : index
      %36 = vector.load %arg6[%c0_18, %c0_19] : memref<1x32xf32, #tpu.memory_space<vmem>>, vector<1x32xf32>
      %37 = vector.broadcast %36 : vector<1x32xf32> to vector<8x32xf32>
      %38 = arith.mulf %35, %37 : vector<8x32xf32>
      %c0_20 = arith.constant 0 : index
      %c0_21 = arith.constant 0 : index
      %39 = vector.load %arg7[%c0_20, %c0_21] : memref<1x32xf32, #tpu.memory_space<vmem>>, vector<1x32xf32>
      %40 = vector.broadcast %39 : vector<1x32xf32> to vector<8x32xf32>
      %41 = arith.addf %38, %40 : vector<8x32xf32>
      %c0_22 = arith.constant 0 : index
      %c0_23 = arith.constant 0 : index
      %42 = vector.load %arg4[%c0_22, %c0_23] : memref<8x32xf32, #tpu.memory_space<vmem>>, vector<8x32xf32>
      %c0_24 = arith.constant 0 : index
      %c0_25 = arith.constant 0 : index
      %43 = vector.load %arg8[%c0_24, %c0_25] : memref<1x32xf32, #tpu.memory_space<vmem>>, vector<1x32xf32>
      %44 = vector.broadcast %43 : vector<1x32xf32> to vector<8x32xf32>
      %45 = arith.mulf %42, %44 : vector<8x32xf32>
      %c0_26 = arith.constant 0 : index
      %c0_27 = arith.constant 0 : index
      %46 = vector.load %arg9[%c0_26, %c0_27] : memref<1x32xf32, #tpu.memory_space<vmem>>, vector<1x32xf32>
      %47 = vector.broadcast %46 : vector<1x32xf32> to vector<8x32xf32>
      %48 = arith.addf %45, %47 : vector<8x32xf32>
      %c0_28 = arith.constant 0 : index
      %c0_29 = arith.constant 0 : index
      %49 = vector.load %arg5[%c0_28, %c0_29] : memref<8x32xf32, #tpu.memory_space<vmem>>, vector<8x32xf32>
      %c0_30 = arith.constant 0 : index
      %c0_31 = arith.constant 0 : index
      %50 = vector.load %arg8[%c0_30, %c0_31] : memref<1x32xf32, #tpu.memory_space<vmem>>, vector<1x32xf32>
      %51 = vector.broadcast %50 : vector<1x32xf32> to vector<8x32xf32>
      %52 = arith.mulf %49, %51 : vector<8x32xf32>
      %c0_32 = arith.constant 0 : index
      %c0_33 = arith.constant 0 : index
      %53 = vector.load %arg9[%c0_32, %c0_33] : memref<1x32xf32, #tpu.memory_space<vmem>>, vector<1x32xf32>
      %54 = vector.broadcast %53 : vector<1x32xf32> to vector<8x32xf32>
      %55 = arith.addf %52, %54 : vector<8x32xf32>
      %56 = arith.truncf %41 : vector<8x32xf32> to vector<8x32xbf16>
      %c0_34 = arith.constant 0 : index
      %c0_35 = arith.constant 0 : index
      %57 = vector.load %arg10[%c0_34, %c0_35] : memref<32x128xbf16, #tpu.memory_space<vmem>>, vector<32x128xbf16>
      %cst_36 = arith.constant dense<0.000000e+00> : vector<8x128xf32>
      %58 = tpu.matmul %56, %57, %cst_36 {dimension_numbers = #tpu.dot_dimension_numbers<[1], [0], [0], [1], [0, 0, 1, 1], [], []>} : vector<8x32xbf16>, vector<32x128xbf16>, vector<8x128xf32> -> vector<8x128xf32>
      %59 = arith.truncf %48 : vector<8x32xf32> to vector<8x32xbf16>
      %c0_37 = arith.constant 0 : index
      %c0_38 = arith.constant 0 : index
      %60 = vector.load %arg11[%c0_37, %c0_38] : memref<32x128xbf16, #tpu.memory_space<vmem>>, vector<32x128xbf16>
      %cst_39 = arith.constant dense<0.000000e+00> : vector<8x128xf32>
      %61 = tpu.matmul %59, %60, %cst_39 {dimension_numbers = #tpu.dot_dimension_numbers<[1], [0], [0], [1], [0, 0, 1, 1], [], []>} : vector<8x32xbf16>, vector<32x128xbf16>, vector<8x128xf32> -> vector<8x128xf32>
      %62 = arith.addf %58, %61 : vector<8x128xf32>
      %63 = arith.truncf %55 : vector<8x32xf32> to vector<8x32xbf16>
      %c0_40 = arith.constant 0 : index
      %c0_41 = arith.constant 0 : index
      %64 = vector.load %arg12[%c0_40, %c0_41] : memref<32x128xbf16, #tpu.memory_space<vmem>>, vector<32x128xbf16>
      %cst_42 = arith.constant dense<0.000000e+00> : vector<8x128xf32>
      %65 = tpu.matmul %63, %64, %cst_42 {dimension_numbers = #tpu.dot_dimension_numbers<[1], [0], [0], [1], [0, 0, 1, 1], [], []>} : vector<8x32xbf16>, vector<32x128xbf16>, vector<8x128xf32> -> vector<8x128xf32>
      %66 = arith.addf %62, %65 : vector<8x128xf32>
      %c0_43 = arith.constant 0 : index
      %c0_44 = arith.constant 0 : index
      %67 = vector.load %arg13[%c0_43, %c0_44] : memref<1x128xf32, #tpu.memory_space<vmem>>, vector<1x128xf32>
      %68 = vector.broadcast %67 : vector<1x128xf32> to vector<8x128xf32>
      %69 = arith.addf %66, %68 : vector<8x128xf32>
      %c0_45 = arith.constant 0 : index
      %c0_46 = arith.constant 0 : index
      %70 = vector.load %arg16[%c0_45, %c0_46] : memref<8x128xf32, #tpu.memory_space<vmem>>, vector<8x128xf32>
      tpu.vector_store %arg16[%c0_45, %c0_46], %69 {strides = array<i32>} : memref<8x128xf32, #tpu.memory_space<vmem>>, vector<8x128xf32>,
      %71 = arith.mulf %69, %69 : vector<8x128xf32>
      %cst_47 = arith.constant dense<0.000000e+00> : vector<8xf32>
      %72 = vector.multi_reduction <add>, %71, %cst_47 [1] : vector<8x128xf32> to vector<8xf32>
      %73 = vector.shape_cast %72 : vector<8xf32> to vector<8x1xf32>
      %cst_48 = arith.constant 9.99999996E-13 : f32
      %74 = vector.broadcast %cst_48 : f32 to vector<8x1xf32>
      %75 = arith.addf %73, %74 : vector<8x1xf32>
      %76 = math.rsqrt %75 : vector<8x1xf32>
      %77 = vector.broadcast %76 : vector<8x1xf32> to vector<8x128xf32>
      %78 = arith.mulf %69, %77 : vector<8x128xf32>
      %79 = arith.truncf %78 : vector<8x128xf32> to vector<8x128xbf16>
      %c0_49 = arith.constant 0 : index
      %c0_50 = arith.constant 0 : index
      %80 = vector.load %arg17[%c0_49, %c0_50] : memref<8x128xbf16, #tpu.memory_space<vmem>>, vector<8x128xbf16>
      tpu.vector_store %arg17[%c0_49, %c0_50], %79 {strides = array<i32>} : memref<8x128xbf16, #tpu.memory_space<vmem>>, vector<8x128xbf16>,
    } else {
    }
    %c0 = arith.constant 0 : index
    %c0_1 = arith.constant 0 : index
    %3 = vector.load %arg17[%c0, %c0_1] : memref<8x128xbf16, #tpu.memory_space<vmem>>, vector<8x128xbf16>
    %c0_2 = arith.constant 0 : index
    %c0_3 = arith.constant 0 : index
    %4 = vector.load %arg14[%c0_2, %c0_3] : memref<128x128xbf16, #tpu.memory_space<vmem>>, vector<128x128xbf16>
    %cst = arith.constant dense<0.000000e+00> : vector<8x128xf32>
    %5 = tpu.matmul %3, %4, %cst {dimension_numbers = #tpu.dot_dimension_numbers<[1], [0], [0], [1], [0, 0, 1, 1], [], []>} : vector<8x128xbf16>, vector<128x128xbf16>, vector<8x128xf32> -> vector<8x128xf32>
    %6 = arith.mulf %5, %5 : vector<8x128xf32>
    %cst_4 = arith.constant 1.000000e+00 : f32
    %7 = vector.broadcast %cst_4 : f32 to vector<8x128xf32>
    %8 = arith.subf %7, %6 : vector<8x128xf32>
    %cst_5 = arith.constant 0.000000e+00 : f32
    %cst_6 = arith.constant 1.000000e+00 : f32
    %9 = vector.broadcast %cst_5 : f32 to vector<8x128xf32>
    %10 = arith.maximumf %9, %8 : vector<8x128xf32>
    %11 = vector.broadcast %cst_6 : f32 to vector<8x128xf32>
    %12 = arith.minimumf %11, %10 : vector<8x128xf32>
    %13 = math.sqrt %12 : vector<8x128xf32>
    %cst_7 = arith.constant 0.87758255 : f32
    %14 = vector.broadcast %cst_7 : f32 to vector<8x128xf32>
    %15 = arith.mulf %5, %14 : vector<8x128xf32>
    %cst_8 = arith.constant 0.47942555 : f32
    %16 = vector.broadcast %cst_8 : f32 to vector<8x128xf32>
    %17 = arith.mulf %13, %16 : vector<8x128xf32>
    %18 = arith.subf %15, %17 : vector<8x128xf32>
    %cst_9 = arith.constant -0.87758255 : f32
    %19 = vector.broadcast %cst_9 : f32 to vector<8x128xf32>
    %20 = arith.cmpf ogt, %5, %19 : vector<8x128xf32>
    %cst_10 = arith.constant 0.239712775 : f32
    %21 = vector.broadcast %cst_10 : f32 to vector<8x128xf32>
    %22 = arith.subf %5, %21 : vector<8x128xf32>
    %23 = arith.select %20, %18, %22 : vector<8x128xi1>, vector<8x128xf32>
    %c128_i32 = arith.constant 128 : i32
    %24 = arith.muli %arg1, %c128_i32 : i32
    %25 = tpu.iota {dimensions = array<i32: 1>} : vector<8x128xi32>
    %26 = vector.broadcast %24 : i32 to vector<8x128xi32>
    %27 = arith.addi %26, %25 : vector<8x128xi32>
    %c0_11 = arith.constant 0 : index
    %c0_12 = arith.constant 0 : index
    %28 = vector.load %arg2[%c0_11, %c0_12] : memref<8x1xi32, #tpu.memory_space<vmem>>, vector<8x1xi32>
    %29 = vector.broadcast %28 : vector<8x1xi32> to vector<8x128xi32>
    %30 = arith.cmpi eq, %27, %29 : vector<8x128xi32>
    %31 = arith.select %30, %23, %5 : vector<8x128xi1>, vector<8x128xf32>
    %cst_13 = arith.constant 3.200000e+01 : f32
    %32 = vector.broadcast %cst_13 : f32 to vector<8x128xf32>
    %33 = arith.mulf %31, %32 : vector<8x128xf32>
    %c0_14 = arith.constant 0 : index
    %c0_15 = arith.constant 0 : index
    %34 = vector.load %arg15[%c0_14, %c0_15] : memref<8x128xf32, #tpu.memory_space<vmem>>, vector<8x128xf32>
    tpu.vector_store %arg15[%c0_14, %c0_15], %33 {strides = array<i32>} : memref<8x128xf32, #tpu.memory_space<vmem>>, vector<8x128xf32>,
    return
  }
  func.func @transform_0(%arg0: i32, %arg1: i32) -> (i32, i32) {
    %c0_i32 = arith.constant 0 : i32
    %c0_i32_0 = arith.constant 0 : i32
    return %arg0, %c0_i32 : i32, i32
  }
  func.func @transform_1(%arg0: i32, %arg1: i32) -> (i32, i32) {
    %c0_i32 = arith.constant 0 : i32
    %c0_i32_0 = arith.constant 0 : i32
    return %arg0, %c0_i32 : i32, i32
  }
  func.func @transform_2(%arg0: i32, %arg1: i32) -> (i32, i32) {
    %c0_i32 = arith.constant 0 : i32
    %c0_i32_0 = arith.constant 0 : i32
    return %arg0, %c0_i32 : i32, i32
  }
  func.func @transform_3(%arg0: i32, %arg1: i32) -> (i32, i32) {
    %c0_i32 = arith.constant 0 : i32
    %c0_i32_0 = arith.constant 0 : i32
    return %arg0, %c0_i32 : i32, i32
  }
  func.func @transform_4(%arg0: i32, %arg1: i32) -> (i32, i32) {
    %c0_i32 = arith.constant 0 : i32
    %c0_i32_0 = arith.constant 0 : i32
    %c0_i32_1 = arith.constant 0 : i32
    return %c0_i32, %c0_i32_0 : i32, i32
  }
  func.func @transform_5(%arg0: i32, %arg1: i32) -> (i32, i32) {
    %c0_i32 = arith.constant 0 : i32
    %c0_i32_0 = arith.constant 0 : i32
    %c0_i32_1 = arith.constant 0 : i32
    return %c0_i32, %c0_i32_0 : i32, i32
  }
  func.func @transform_6(%arg0: i32, %arg1: i32) -> (i32, i32) {
    %c0_i32 = arith.constant 0 : i32
    %c0_i32_0 = arith.constant 0 : i32
    %c0_i32_1 = arith.constant 0 : i32
    return %c0_i32, %c0_i32_0 : i32, i32
  }
  func.func @transform_7(%arg0: i32, %arg1: i32) -> (i32, i32) {
    %c0_i32 = arith.constant 0 : i32
    %c0_i32_0 = arith.constant 0 : i32
    %c0_i32_1 = arith.constant 0 : i32
    return %c0_i32, %c0_i32_0 : i32, i32
  }
  func.func @transform_8(%arg0: i32, %arg1: i32) -> (i32, i32) {
    %c0_i32 = arith.constant 0 : i32
    %c0_i32_0 = arith.constant 0 : i32
    %c0_i32_1 = arith.constant 0 : i32
    return %c0_i32, %c0_i32_0 : i32, i32
  }
  func.func @transform_9(%arg0: i32, %arg1: i32) -> (i32, i32) {
    %c0_i32 = arith.constant 0 : i32
    %c0_i32_0 = arith.constant 0 : i32
    %c0_i32_1 = arith.constant 0 : i32
    return %c0_i32, %c0_i32_0 : i32, i32
  }
  func.func @transform_10(%arg0: i32, %arg1: i32) -> (i32, i32) {
    %c0_i32 = arith.constant 0 : i32
    %c0_i32_0 = arith.constant 0 : i32
    %c0_i32_1 = arith.constant 0 : i32
    return %c0_i32, %c0_i32_0 : i32, i32
  }
  func.func @transform_11(%arg0: i32, %arg1: i32) -> (i32, i32) {
    %c0_i32 = arith.constant 0 : i32
    %c0_i32_0 = arith.constant 0 : i32
    %c0_i32_1 = arith.constant 0 : i32
    return %c0_i32, %c0_i32_0 : i32, i32
  }
  func.func @transform_12(%arg0: i32, %arg1: i32) -> (i32, i32) {
    %c0_i32 = arith.constant 0 : i32
    %c0_i32_0 = arith.constant 0 : i32
    return %c0_i32, %arg1 : i32, i32
  }
  func.func @transform_13(%arg0: i32, %arg1: i32) -> (i32, i32) {
    %c0_i32 = arith.constant 0 : i32
    return %arg0, %arg1 : i32, i32
  }
  func.func @transform_14(%arg0: i32, %arg1: i32) -> (i32, i32) {
    %c0_i32 = arith.constant 0 : i32
    %c0_i32_0 = arith.constant 0 : i32
    return %arg0, %c0_i32 : i32, i32
  }
}

</mosaic_0001>

<bundles_post_ra>
// kernel: tpu_custom_call.1
= control target key start
LH: loop header
LB: loop body
LE: loop exit
PB: predicated region body
PF: predicated region fallthrough
CT: control target
= control target key end

     0   :  { %20 = vsyncpa [#allocation4], 0  ;;  %s1071_s0 = inlined_call_operand.vmem [shape: s32[8,1], index: 0, kind: input, shape index: {}]   ;;  %s1072_s1 = inlined_call_operand.hbm [shape: f32[8,32], index: 1, kind: input, shape index: {}]   ;;  %s1073_s2 = inlined_call_operand.hbm [shape: f32[8,32], index: 2, kind: input, shape index: {}]   ;;  %s1074_s3 = inlined_call_operand.hbm [shape: f32[8,32], index: 3, kind: input, shape index: {}]   ;;  %s1075_s4 = inlined_call_operand.vmem [shape: f32[1,32], index: 4, kind: input, shape index: {}]   ;;  %s1076_s5 = inlined_call_operand.vmem [shape: f32[1,32], index: 5, kind: input, shape index: {}]   ;;  %s1077_s6 = inlined_call_operand.vmem [shape: f32[1,32], index: 6, kind: input, shape index: {}]   ;;  %s1078_s7 = inlined_call_operand.hbm [shape: f32[1,32], index: 7, kind: input, shape index: {}]   ;;  %s1079_s8 = inlined_call_operand.vmem [shape: bf16[32,128], index: 8, kind: input, shape index: {}]   ;;  %s1080_s9 = inlined_call_operand.vmem [shape: bf16[32,128], index: 9, kind: input, shape index: {}]   ;;  %s1081_s10 = inlined_call_operand.hbm [shape: bf16[32,128], index: 10, kind: input, shape index: {}]   ;;  %s1082_s11 = inlined_call_operand.vmem [shape: f32[1,128], index: 11, kind: input, shape index: {}]   ;;  %s1083_s12 = inlined_call_operand.hbm [shape: bf16[128,128], index: 12, kind: input, shape index: {}]   ;;  %s1084_s13 = inlined_call_operand.hbm [shape: f32[8,128], index: 13, kind: output, shape index: {0}]   ;;  %s1085_s14 = inlined_call_operand.hbm [shape: f32[8,128], index: 14, kind: output, shape index: {1}]  }
   0x1   :  { %21 = vsyncpa [#allocation7], 0 }
   0x2   :  { %22 = vsyncpa [#allocation10], 0 }
   0x3   :  { %23 = vsyncpa [#allocation13], 0 }
   0x4   :  { %24 = vsyncpa [#allocation5], 0 }
   0x5   :  { %25 = vsyncpa [#allocation16], 0  ;;  %s835_s29 = smov [#allocation6]   ;;  %s836_s15 = smov [#allocation9]  }
   0x6   :  { %s44_s30 = sshll.u32 %s835_s29, 4  ;;  %s70_s16 = sshll.u32 %s836_s15, 4  ;;  %s45_s30 = int_to_ptr.vmem [resolvable:$true] %s44_s30  ;;  %s71_s16 = int_to_ptr.vmem [resolvable:$true] %s70_s16 }
   0x7   :  { %s647_s19 = scalar_lea.hbm %s1073_s2, 128 }
   0x8   :  { %p648_p0 = scmp.ne.s32.totalorder %s1073_s2, %s647_s19  ;;  %p651_p1 = scmp.lt.u32.totalorder %s647_s19, %s1073_s2 }
   0xa   :  { %p653_p2 = pnand %p651_p1, %p648_p0 }
   0xc   :  { %656 = shalt.err (!%p653_p2)
}
   0xd   :  { %s657_s24 = scalar_lea.vmem %s45_s30, 128  ;;  %p662_p4 = scmp.lt.s32.totalorder %s45_s30, %s45_s30 }
   0xe   :  { %p658_p3 = scmp.ne.s32.totalorder %s45_s30, %s657_s24  ;;  %p663_p5 = scmp.lt.s32.totalorder %s657_s24, %s657_s24 }
  0x10   :  { %p664_p6 = por %p663_p5, %p662_p4 }
  0x12   :  { %p665_p7 = pnand %p664_p6, %p658_p3 }
  0x14   :  { %668 = shalt.err (!%p665_p7)
}
  0x15   :  { %47 = dma.hbm_to_vmem [thread:$0]  %s1073_s2, 128, %s45_s30, [#allocation7]  }
  0x16   :  { %s669_s29 = scalar_lea.hbm %s1078_s7, 16 }
  0x17   :  { %p670_p8 = scmp.ne.s32.totalorder %s1078_s7, %s669_s29  ;;  %p673_p9 = scmp.lt.u32.totalorder %s669_s29, %s1078_s7 }
  0x19   :  { %p675_p10 = pnand %p673_p9, %p670_p8 }
  0x1b   :  { %678 = shalt.err (!%p675_p10)
}
  0x1c   :  { %s679_s20 = scalar_lea.vmem %s71_s16, 16  ;;  %s683_s21 = scalar_lea.vmem %s71_s16, 32 }
  0x1d   :  { %p680_p11 = scmp.ne.s32.totalorder %s71_s16, %s679_s20  ;;  %p684_p12 = scmp.lt.s32.totalorder %s71_s16, %s71_s16 }
  0x1e   :  { %p685_p13 = scmp.lt.s32.totalorder %s683_s21, %s679_s20 }
  0x20   :  { %p686_p0 = por %p685_p13, %p684_p12 }
  0x22   :  { %p687_p1 = pnand %p686_p0, %p680_p11 }
  0x24   :  { %690 = shalt.err (!%p687_p1)
}
  0x25   :  { %73 = dma.hbm_to_vmem [thread:$0]  %s1078_s7, 16, %s71_s16, [#allocation10]  }
  0x26   :  { %s837_s22 = smov [#allocation3]   ;;  %s838_s24 = smov [#allocation8]  }
  0x27   :  { %s34_s23 = sshll.u32 %s837_s22, 4  ;;  %s54_s25 = sshll.u32 %s838_s24, 4  ;;  %s35_s23 = int_to_ptr.vmem [resolvable:$true] %s34_s23  ;;  %s55_s25 = int_to_ptr.vmem [resolvable:$true] %s54_s25 }
  0x28   :  { %s691_s28 = scalar_lea.hbm %s1072_s1, 128 }
  0x29   :  { %p692_p2 = scmp.ne.s32.totalorder %s1072_s1, %s691_s28  ;;  %p695_p3 = scmp.lt.u32.totalorder %s691_s28, %s1072_s1 }
  0x2b   :  { %p697_p4 = pnand %p695_p3, %p692_p2 }
  0x2d   :  { %700 = shalt.err (!%p697_p4)
}
  0x2e   :  { %s701_s7 = scalar_lea.vmem %s35_s23, 128  ;;  %p706_p6 = scmp.lt.s32.totalorder %s35_s23, %s35_s23 }
  0x2f   :  { %p702_p5 = scmp.ne.s32.totalorder %s35_s23, %s701_s7  ;;  %p707_p7 = scmp.lt.s32.totalorder %s701_s7, %s701_s7 }
  0x31   :  { %p708_p8 = por %p707_p7, %p706_p6 }
  0x33   :  { %p709_p9 = pnand %p708_p8, %p702_p5 }
  0x35   :  { %712 = shalt.err (!%p709_p9)
}
  0x36   :  { %37 = dma.hbm_to_vmem [thread:$0]  %s1072_s1, 128, %s35_s23, [#allocation4]  }
  0x37   :  { %s713_s2 = scalar_lea.hbm %s1074_s3, 128 }
  0x38   :  { %p714_p10 = scmp.ne.s32.totalorder %s1074_s3, %s713_s2  ;;  %p717_p11 = scmp.lt.u32.totalorder %s713_s2, %s1074_s3 }
  0x3a   :  { %p719_p12 = pnand %p717_p11, %p714_p10 }
  0x3c   :  { %722 = shalt.err (!%p719_p12)
}
  0x3d   :  { %s723_s27 = scalar_lea.vmem %s55_s25, 128  ;;  %p728_p0 = scmp.lt.s32.totalorder %s55_s25, %s55_s25 }
  0x3e   :  { %p724_p13 = scmp.ne.s32.totalorder %s55_s25, %s723_s27  ;;  %p729_p1 = scmp.lt.s32.totalorder %s723_s27, %s723_s27 }
  0x40   :  { %p730_p2 = por %p729_p1, %p728_p0 }
  0x42   :  { %p731_p3 = pnand %p730_p2, %p724_p13 }
  0x44   :  { %734 = shalt.err (!%p731_p3)
}
  0x45   :  { %57 = dma.hbm_to_vmem [thread:$0]  %s1074_s3, 128, %s55_s25, [#allocation7]  }
  0x46   :  { %s839_s28 = smov [#allocation11]   ;;  %s735_s18 = scalar_lea.hbm %s1081_s10, 256 }
  0x47   :  { %s83_s29 = sshll.u32 %s839_s28, 4  ;;  %p736_p4 = scmp.ne.s32.totalorder %s1081_s10, %s735_s18  ;;  %s84_s29 = int_to_ptr.vmem [resolvable:$true] %s83_s29 }
  0x48   :  { %p739_p5 = scmp.lt.u32.totalorder %s735_s18, %s1081_s10 }
  0x4a   :  { %p741_p6 = pnand %p739_p5, %p736_p4 }
  0x4c   :  { %744 = shalt.err (!%p741_p6)
}
  0x4d   :  { %s745_s21 = scalar_lea.vmem %s84_s29, 256  ;;  %p750_p8 = scmp.lt.s32.totalorder %s84_s29, %s84_s29 }
  0x4e   :  { %p746_p7 = scmp.ne.s32.totalorder %s84_s29, %s745_s21  ;;  %p751_p9 = scmp.lt.s32.totalorder %s745_s21, %s745_s21 }
  0x50   :  { %p752_p10 = por %p751_p9, %p750_p8 }
  0x52   :  { %p753_p11 = pnand %p752_p10, %p746_p7 }
  0x54   :  { %756 = shalt.err (!%p753_p11)
}
  0x55   :  { %s840_s3 = smov 64   ;;  %s841_s25 = smov 4  }
  0x56   :  { %89 = dma.hbm_to_vmem [thread:$0]  %s1081_s10, 256, %s84_s29, [#allocation10], %s840_s3, %s840_s3, %s841_s25  }
  0x57   :  { %s842_s22 = smov [#allocation12]   ;;  %s757_s1 = scalar_lea.hbm %s1083_s12, 1024 }
  0x58   :  { %s97_s24 = sshll.u32 %s842_s22, 4  ;;  %p758_p12 = scmp.ne.s32.totalorder %s1083_s12, %s757_s1  ;;  %s98_s24 = int_to_ptr.vmem [resolvable:$true] %s97_s24 }
  0x59   :  { %p761_p13 = scmp.lt.u32.totalorder %s757_s1, %s1083_s12 }
  0x5b   :  { %p763_p0 = pnand %p761_p13, %p758_p12 }
  0x5d   :  { %766 = shalt.err (!%p763_p0)
}
  0x5e   :  { %s767_s18 = scalar_lea.vmem %s98_s24, 1024  ;;  %p772_p2 = scmp.lt.s32.totalorder %s98_s24, %s98_s24 }
  0x5f   :  { %p768_p1 = scmp.ne.s32.totalorder %s98_s24, %s767_s18  ;;  %p773_p3 = scmp.lt.s32.totalorder %s767_s18, %s767_s18 }
  0x61   :  { %p774_p4 = por %p773_p3, %p772_p2 }
  0x63   :  { %p775_p5 = pnand %p774_p4, %p768_p1 }
  0x65   :  { %778 = shalt.err (!%p775_p5)
}
  0x66   :  { %103 = dma.hbm_to_vmem [thread:$0]  %s1083_s12, 1024, %s98_s24, [#allocation13], %s840_s3, %s840_s3, %s841_s25  }
  0x67   :  { %823 = dma.done.wait [#allocation4], 128  }
  0x68   :  { %824 = vsyncadd [#allocation4], 4294967168 }
  0x69   :  { %825 = dma.done.wait [#allocation7], 256  }
  0x6a   :  { %826 = vsyncadd [#allocation7], 4294967040 }
  0x6b   :  { %827 = dma.done.wait [#allocation10], 272  }
  0x6c   :  { %828 = vsyncadd [#allocation10], 4294967024 }
  0x6d   :  { %829 = dma.done.wait [#allocation13], 1024  }
  0x6e   :  { %830 = vsyncadd [#allocation13], 4294966272  ;;  %v843_v0 = vmov 0.0   ;;  %vm844_vm0 = vmmov 0   ;;  %v629_v1 = vld [vmem:[%s1080_s9] sm:$0xff]   ;;  %v630_v2 = vld [vmem:[%s1080_s9 + $0x8] sm:$0xff]  }
  0x6f   :  { %571 = vmatprep.subr.bf16.mxu0 %v843_v0  ;;  %575 = vmatprep.mubr.msk.bf16.mxu0 %vm844_vm0, %v843_v0  ;;  %v144_v3 = vld [vmem:[#allocation6] sm:$0xff]  ;;  %v532_v4 = vld [vmem:[%s1077_s6] ss:$0 sm:$0xff]  ;;  %v533_v5 = vld [vmem:[#allocation9] ss:$0 sm:$0xff]  ;;  %vm186_vm1 = vcmask 261120  }
  0x70   :  { %595 = vmatprep.subr.bf16.mxu1 %v843_v0  ;;  %611 = vmatprep.mubr.msk.bf16.mxu1 %vm844_vm0, %v843_v0  ;;  %v152_v6 = vmul.f32 %v532_v4, %v144_v3  ;;  %v631_v8 = vld [vmem:[%s1079_s8] sm:$0xff]   ;;  %v127_v9 = vld [vmem:[#allocation3] sm:$0xff]  ;;  %v635_v23 = vld [vmem:[#allocation12] sm:$0xff]   ;;  %v845_v49 = vmov 0   ;;  %s846_s26 = smov [#allocation15]  }
  0x71   :  { %572 = vmatpush3.bf16.msra.mxu0 %v629_v1  ;;  %v530_v10 = vld [vmem:[%s1075_s4] ss:$0 sm:$0xff]  ;;  %v632_v15 = vld [vmem:[%s1079_s8 + $0x8] sm:$0xff]   ;;  %596 = vmatpush3.bf16.msra.mxu1 %v635_v23  ;;  %v639_v44 = vld [vmem:[#allocation12 + $0x20] sm:$0xff]   ;;  %s514_s27 = sshll.u32 %s846_s26, 4  ;;  %s515_s27 = int_to_ptr.vmem [resolvable:$true] %s514_s27 }
  0x72   :  { %573 = vmatprep.subr.bf16.mxu0 %v843_v0  ;;  %v160_v7 = vadd.f32 %v533_v5, %v152_v6  ;;  %v135_v11 = vmul.f32 %v530_v10, %v127_v9  ;;  %v531_v12 = vld [vmem:[%s1076_s5] ss:$0 sm:$0xff]  ;;  %v633_v19 = vld [vmem:[#allocation11] sm:$0xff]   ;;  %v634_v21 = vld [vmem:[#allocation11 + $0x8] sm:$0xff]   ;;  %597 = vmatprep.subr.bf16.mxu1 %v843_v0  ;;  %s779_s1 = scalar_lea.vmem %s515_s27, 128  ;;  %p784_p7 = scmp.lt.s32.totalorder %s515_s27, %s515_s27 }
  0x73   :  { %v161_v14 = vld [vmem:[#allocation8] sm:$0xff]  ;;  %v637_v42 = vld [vmem:[#allocation12 + $0x10] sm:$0xff]   ;;  %v638_v43 = vld [vmem:[#allocation12 + $0x18] sm:$0xff]   ;;  %628 = vset.pattern.permute.xlu0 %v845_v49  ;;  %p780_p6 = scmp.ne.s32.totalorder %s515_s27, %s779_s1  ;;  %p785_p8 = scmp.lt.s32.totalorder %s779_s1, %s779_s1 }
  0x74   :  { %v169_v13 = vpack.c.bf16 %v160_v7, %v160_v7  ;;  %v143_v16 = vadd.f32 %v531_v12, %v135_v11  ;;  %v162_v17 = vmul.f32 %v532_v4, %v161_v14  ;;  %v636_v24 = vld [vmem:[#allocation12 + $0x8] sm:$0xff]   ;;  %v641_v46 = vld [vmem:[#allocation12 + $0x30] sm:$0xff]   ;;  %v642_v47 = vld [vmem:[#allocation12 + $0x38] sm:$0xff]  }
  0x75   :  { %574 = vmatpush3.bf16.msra.mxu0 %v630_v2  ;;  %598 = vmatpush3.bf16.msra.mxu1 %v636_v24  ;;  %v543_v35 = vld [vmem:[%s1082_s11] ss:$0 sm:$0xff]  ;;  %p786_p9 = por %p785_p8, %p784_p7 }
  0x76   :  { %579 = vmatprep.subr.bf16.mxu0 %v843_v0  ;;  %v164_v18 = vpack.c.bf16 %v143_v16, %v143_v16  ;;  %v163_v20 = vadd.f32 %v533_v5, %v162_v17  ;;  %599 = vmatprep.subr.bf16.mxu1 %v843_v0  ;;  %v640_v45 = vld [vmem:[#allocation12 + $0x28] sm:$0xff]  }
  0x77   :  { %v490_v48 = vld [vmem:[%s1071_s0] sm:$0xff]  ;;  %p787_p10 = pnand %p786_p9, %p780_p6 }
  0x78   :  { %576 = vmatmul.mubr.msk.bf16.vlgmr.msra.gmra.mrb[0].mxu0 %vm186_vm1, %v169_v13  ;;  %v285_v22 = vpack.c.bf16 %v163_v20, %v163_v20 }
  0x79   :  { %580 = vmatpush3.bf16.msra.mxu0 %v631_v8  ;;  %583 = vmatprep.mubr.msk.bf16.mxu0 %vm844_vm0, %v843_v0 }
  0x7a   :  { %581 = vmatprep.subr.bf16.mxu0 %v843_v0  ;;  %600 = vmatpush3.bf16.msra.mxu1 %v637_v42 }
  0x7b   :  { %601 = vmatprep.subr.bf16.mxu1 %v843_v0 }
  0x7d   :  { %582 = vmatpush3.bf16.msra.mxu0 %v632_v15 }
  0x7e   :  { %587 = vmatprep.subr.bf16.mxu0 %v843_v0  ;;  %602 = vmatpush3.bf16.msra.mxu1 %v638_v43 }
  0x7f   :  { %603 = vmatprep.subr.bf16.mxu1 %v843_v0 }
  0x80   :  { %584 = vmatmul.mubr.msk.bf16.vlgmr.msra.gmra.mrb[4].mxu0 %vm186_vm1, %v164_v18 }
  0x81   :  { %588 = vmatpush3.bf16.msra.mxu0 %v633_v19  ;;  %591 = vmatprep.mubr.msk.bf16.mxu0 %vm844_vm0, %v843_v0 }
  0x82   :  { %589 = vmatprep.subr.bf16.mxu0 %v843_v0  ;;  %604 = vmatpush3.bf16.msra.mxu1 %v639_v44 }
  0x83   :  { %605 = vmatprep.subr.bf16.mxu1 %v843_v0 }
  0x85   :  { %590 = vmatpush3.bf16.msra.mxu0 %v634_v21 }
  0x86   :  { %606 = vmatpush3.bf16.msra.mxu1 %v640_v45 }
  0x87   :  { %607 = vmatprep.subr.bf16.mxu1 %v843_v0 }
  0x88   :  { %592 = vmatmul.mubr.msk.bf16.vlgmr.msra.gmra.mrb[8].mxu0 %vm186_vm1, %v285_v22 }
  0x8a   :  { %608 = vmatpush3.bf16.msra.mxu1 %v641_v46 }
  0x8b   :  { %609 = vmatprep.subr.bf16.mxu1 %v843_v0 }
  0x8e   :  { %610 = vmatpush3.bf16.msra.mxu1 %v642_v47 }
 0x14b   :  { %v224_v25 = vpop.f32.mrb[0].mxu0 }
 0x14c   :  { %v577_v26 = vpop.f32.mrb[1].mxu0 }
 0x14d   :  { %v227_v27 = vpop.f32.mrb[2].mxu0 }
 0x14e   :  { %v578_v28 = vpop.f32.mrb[3].mxu0 }
 0x153   :  { %v279_v29 = vpop.f32.mrb[4].mxu0 }
 0x154   :  { %v280_v30 = vadd.f32 %v279_v29, %v224_v25  ;;  %v585_v31 = vpop.f32.mrb[5].mxu0 }
 0x155   :  { %v282_v32 = vpop.f32.mrb[6].mxu0 }
 0x156   :  { %v586_v33 = vpop.f32.mrb[7].mxu0 }
 0x15b   :  { %v339_v34 = vpop.f32.mrb[8].mxu0 }
 0x15c   :  { %v345_v36 = vadd.f32 %v339_v34, %v280_v30  ;;  %v593_v37 = vpop.f32.mrb[9].mxu0 }
 0x15d   :  { %v342_v38 = vpop.f32.mrb[10].mxu0 }
 0x15e   :  { %v353_v39 = vadd.f32 %v543_v35, %v345_v36  ;;  %v594_v40 = vpop.f32.mrb[11].mxu0 }
 0x160   :  { %354 = vst [vmem:[#allocation15] sm:$0xff] %v353_v39  ;;  %v355_v41 = vmul.f32 %v353_v39, %v353_v39 }
 0x162   :  { %356 = vadd.xlane.f32.xlu0 %v355_v41 }
 0x178   :  { %492 = vperm.xlu0 %628, %v490_v48  }
 0x1ef   :  { %v357_v50 = vpop.xlane.xlu0 %356 }
 0x1f0   :  { %v358_v51 = vadd.f32 1e-12, %v357_v50 }
 0x1f2   :  { %643 = vrsqrt.f32 %v358_v51 }
 0x1fc   :  { %v644_v52 = vpop.eup %643 }
 0x1fd   :  { %v360_v53 = vmul.f32 %v644_v52, %v353_v39 }
 0x1ff   :  { %v361_v54 = vpack.c.bf16 %v360_v53, %v360_v53 }
 0x201   :  { %362 = vst [vmem:[#allocation2] sm:$0xf] %v361_v54 }
 0x208   :  { %v363_v55 = vld [vmem:[#allocation2] sm:$0xf] }
 0x209   :  { %612 = vmatmul.mubr.bf16.vlgmr.msra.gmra.mrb[0].mxu1 %v363_v55 }
 0x20a   :  { %790 = shalt.err (!%p787_p10)
}
 0x20b   :  { %s791_s28 = scalar_lea.hbm %s1085_s14, 128 }
 0x20c   :  { %p792_p11 = scmp.ne.s32.totalorder %s1085_s14, %s791_s28  ;;  %p795_p12 = scmp.lt.u32.totalorder %s791_s28, %s1085_s14 }
 0x20e   :  { %p797_p13 = pnand %p795_p12, %p792_p11 }
 0x210   :  { %800 = shalt.err (!%p797_p13)
}
 0x211   :  { %517 = dma.vmem_to_hbm [thread:$0]  %s515_s27, 128, %s1085_s14, [#allocation16]   ;;  %v486_v0 = vlaneseq  ;;  %v493_v7 = vpop.permute.xlu0 %492 }
 0x212   :  { %s847_s14 = smov [#allocation14]  }
 0x213   :  { %v487_v5 = vand.u32 127, %v486_v0  ;;  %s504_s7 = sshll.u32 %s847_s14, 4  ;;  %s505_s7 = int_to_ptr.vmem [resolvable:$true] %s504_s7 }
 0x214   :  { %s801_s16 = scalar_lea.vmem %s505_s7, 128  ;;  %p806_p1 = scmp.lt.s32.totalorder %s505_s7, %s505_s7 }
 0x215   :  { %vm494_vm4 = vcmp.eq.s32.totalorder %v487_v5, %v493_v7  ;;  %p802_p0 = scmp.ne.s32.totalorder %s505_s7, %s801_s16  ;;  %p807_p2 = scmp.lt.s32.totalorder %s801_s16, %s801_s16 }
 0x217   :  { %p808_p3 = por %p807_p2, %p806_p1 }
 0x219   :  { %p809_p4 = pnand %p808_p3, %p802_p0 }
 0x2dc   :  { %v462_v56 = vpop.f32.mrb[0].mxu1 }
 0x2dd   :  { %v468_v57 = vmul.f32 %v462_v56, %v462_v56  ;;  %v613_v58 = vpop.f32.mrb[1].mxu1  ;;  %v479_v8 = vmul.f32 0.87758255, %v462_v56  ;;  %v552_v10 = vadd.f32 -0.23971277, %v462_v56 }
 0x2de   :  { %v465_v59 = vpop.f32.mrb[2].mxu1  ;;  %vm482_vm5 = vcmp.gt.f32.partialorder %v462_v56, -0.87758255 }
 0x2df   :  { %v469_v60 = vsub.f32 1.0, %v468_v57  ;;  %v614_v61 = vpop.f32.mrb[3].mxu1 }
 0x2e1   :  { %v470_v62 = vmax.f32 %v469_v60, 0.0 }
 0x2e3   :  { %v471_v63 = vmin.f32 %v470_v62, 1.0 }
 0x2e5   :  { %645 = vrsqrt.f32 %v471_v63  ;;  %vm474_vm2 = vcmp.eq.f32.partialorder %v471_v63, inf  ;;  %v477_v3 = vand.u32 2147483648, %v471_v63  ;;  %vm476_vm3 = vcmp.eq.f32.partialorder %v471_v63, 0.0 }
 0x2ef   :  { %v646_v1 = vpop.eup %645 }
 0x2f0   :  { %v473_v2 = vmul.f32 %v646_v1, %v471_v63 }
 0x2f2   :  { %v475_v4 = vsel %vm474_vm2, %v471_v63, %v473_v2 }
 0x2f3   :  { %v478_v6 = vsel %vm476_vm3, %v477_v3, %v475_v4 }
 0x2f4   :  { %v480_v9 = vmul.f32 0.47942555, %v478_v6 }
 0x2f6   :  { %v481_v11 = vsub.f32 %v479_v8, %v480_v9 }
 0x2f8   :  { %v484_v12 = vsel %vm482_vm5, %v481_v11, %v552_v10 }
 0x2f9   :  { %v495_v13 = vsel %vm494_vm4, %v484_v12, %v462_v56 }
 0x2fa   :  { %v496_v14 = vmul.f32 32.0, %v495_v13 }
 0x2fc   :  { %497 = vst [vmem:[#allocation14] sm:$0xff] %v496_v14 }
 0x2fd   :  { %812 = shalt.err (!%p809_p4)
}
 0x2fe   :  { %s813_s21 = scalar_lea.hbm %s1084_s13, 128 }
 0x2ff   :  { %p814_p5 = scmp.ne.s32.totalorder %s1084_s13, %s813_s21  ;;  %p817_p6 = scmp.lt.u32.totalorder %s813_s21, %s1084_s13 }
 0x301   :  { %p819_p7 = pnand %p817_p6, %p814_p5 }
 0x303   :  { %822 = shalt.err (!%p819_p7)
}
 0x304   :  { %507 = dma.vmem_to_hbm [thread:$0]  %s505_s7, 128, %s1084_s13, [#allocation5]  }
 0x305   :  { %831 = dma.done.wait [#allocation5], 128  }
 0x306   :  { %832 = vsyncadd [#allocation5], 4294967168 }
 0x307   :  { %833 = dma.done.wait [#allocation16], 128  }
 0x308   :  { %834 = vsyncadd [#allocation16], 4294967168 }
 0x309   :  { %524 = vsyncpa [#allocation4], 1 }
 0x30a   :  { %525 = vsyncpa [#allocation7], 1 }
 0x30b   :  { %526 = vsyncpa [#allocation10], 1 }
 0x30c   :  { %527 = vsyncpa [#allocation13], 1 }
 0x30d   :  { %528 = vsyncpa [#allocation5], 1 }
 0x30e   :  { %529 = vsyncpa [#allocation16], 1 }

</bundles_post_ra>
